<compile_context>
chip_gen: v5e
topology: v5e:2x2
jax: 0.10.0
libtpu: 0.0.40
codegen_flags: <defaults>
</compile_context>

<pallas_src>
import jax
import jax.numpy as jnp
from jax.experimental import pallas as pl
from jax.experimental.pallas import tpu as pltpu


def _round_up(n, m):
    return (n + m - 1) // m * m


def _ceil_div(n, m):
    return -(-n // m)


def policy_mlp_kernel(x_ref, p_ref, o_ref):
    # p = [ w1 (in,128) ; b1 (1,128) ; w2_pad (128,128) ; b2_pad (1,128) ]
    in_size = x_ref.shape[1]
    hidden = p_ref.shape[1]
    n_out = o_ref.shape[1]

    x = x_ref[...]                                              # (TB, in) f32
    w1 = p_ref[:in_size, :]                                     # (in, 128)
    b1 = p_ref[in_size:in_size + 1, :]                          # (1, 128)
    w2 = p_ref[in_size + 1:in_size + 1 + hidden, :]             # (128, 128) zero-padded cols
    b2 = p_ref[in_size + 1 + hidden:, :]                        # (1, 128)   zero-padded cols

    # Layer 1 on the MXU (tiny K pipelines under the layer-2 matmul).
    h = jnp.dot(x, w1, preferred_element_type=jnp.float32) + b1
    h = jnp.maximum(h, 0.0)                                     # ReLU

    # Layer 2 on the MXU; compute stays lane-padded (TB, 128) ...
    o = jnp.dot(h, w2, preferred_element_type=jnp.float32) + b2
    # ... but only the real n_actions lanes are written back to HBM.
    o_ref[...] = o[:, :n_out].astype(o_ref.dtype)


def pack_params(w1, b1, w2, b2):
    """Pack all params into one (in+1+hidden+1, 128) f32 buffer.

    Call ONCE per weight update (not in the per-step forward path).
    w1: (in, hidden=128); b1: (hidden,)/(1,hidden); w2: (hidden, n); b2: (n,)/(1,n).
    """
    in_size, hidden = w1.shape
    n_actions = w2.shape[1]
    assert hidden == 128 and n_actions <= hidden, "merged packing assumes hidden=128, n_actions<=128"
    b1 = jnp.reshape(b1, (1, hidden)).astype(jnp.float32)
    w2p = jnp.zeros((hidden, hidden), jnp.float32).at[:, :n_actions].set(w2.astype(jnp.float32))
    b2p = jnp.zeros((1, hidden), jnp.float32).at[:, :n_actions].set(
        jnp.reshape(b2, (1, n_actions)).astype(jnp.float32))
    return jnp.concatenate([w1.astype(jnp.float32), b1, w2p, b2p], axis=0)  # (in+1+hidden+1, 128)


def policy_gradient_forward(x, packed_params, *, n_actions, max_tile=2048):
    """x: (B, input_size) f32; packed_params: output of pack_params()."""
    B, in_size = x.shape
    hidden = packed_params.shape[1]

    # Balanced batch tiling: near-equal tiles, <=7 padded rows total.
    n_tiles = _ceil_div(B, max_tile)
    tb = _round_up(_ceil_div(B, n_tiles), 8)
    b_pad = n_tiles * tb

    x_p = x.astype(jnp.float32)
    if b_pad != B:
        x_p = jnp.pad(x_p, ((0, b_pad - B), (0, 0)))

    flops = 2 * b_pad * in_size * hidden + 2 * b_pad * hidden * hidden
    bytes_accessed = 4 * (x_p.size + packed_params.size + b_pad * n_actions)

    out = pl.pallas_call(
        policy_mlp_kernel,
        out_shape=jax.ShapeDtypeStruct((b_pad, n_actions), jnp.float32),
        grid=(n_tiles,),
        in_specs=[
            pl.BlockSpec((tb, in_size), lambda i: (i, 0)),            # x tile (rows)
            pl.BlockSpec(packed_params.shape, lambda i: (0, 0)),      # all params, VMEM-resident
        ],
        out_specs=pl.BlockSpec((tb, n_actions), lambda i: (i, 0)),    # narrow output, no col slice
        compiler_params=pltpu.CompilerParams(
            dimension_semantics=("parallel",)),                       # shards batch across v7x TCs
        cost_estimate=pl.CostEstimate(
            flops=flops, transcendentals=0, bytes_accessed=bytes_accessed),
    )(x_p, packed_params)

    if b_pad != B:
        out = out[:B]   # padded rows contain relu(b1)@w2+b2 garbage -> drop them
    return out


def init_params(key, input_size, n_actions, hidden=128):
    """Deterministic init mimicking PyTorch nn.Linear default:
       U(-1/sqrt(fan_in), 1/sqrt(fan_in)) for both weight and bias."""
    k1, k2, k3, k4 = jax.random.split(key, 4)
    bound1 = 1.0 / jnp.sqrt(jnp.float32(input_size))
    bound2 = 1.0 / jnp.sqrt(jnp.float32(hidden))
    # PyTorch weight is (out, in); store transposed (in, out) for the kernel.
    w1 = jax.random.uniform(k1, (input_size, hidden), jnp.float32, -bound1, bound1)
    b1 = jax.random.uniform(k2, (1, hidden), jnp.float32, -bound1, bound1)
    w2 = jax.random.uniform(k3, (hidden, n_actions), jnp.float32, -bound2, bound2)
    b2 = jax.random.uniform(k4, (1, n_actions), jnp.float32, -bound2, bound2)
    return w1, b1, w2, b2


def _reference(x, w1, b1, w2, b2):
    return jnp.maximum(x @ w1 + b1, 0.0) @ w2 + b2


if __name__ == "__main__":
    # CartPole-like sizes: observation dim 4, 2 actions.
    INPUT_SIZE, N_ACTIONS = 4, 2
    key = jax.random.PRNGKey(0)
    kx, kp, kx2 = jax.random.split(key, 3)
    w1, b1, w2, b2 = init_params(kp, INPUT_SIZE, N_ACTIONS)

    # Pack params once (outside the rollout loop).
    packed = jax.block_until_ready(pack_params(w1, b1, w2, b2))

    fwd = jax.jit(policy_gradient_forward, static_argnames=("n_actions", "max_tile"))

    # Small, non-multiple-of-8 batch (launch-bound regime, single tile, row padding).
    B = 5
    x = jax.random.normal(kx, (B, INPUT_SIZE), dtype=jnp.float32)
    out = jax.block_until_ready(fwd(x, packed, n_actions=N_ACTIONS))
    ref = _reference(x, w1, b1, w2, b2)
    assert out.shape == (B, N_ACTIONS)
    assert jnp.allclose(out, ref, atol=1e-4, rtol=1e-4)

    # Larger rollout batch exercises balanced tiling (2 tiles) + the parallel grid.
    B2 = 3000
    x2 = jax.random.normal(kx2, (B2, INPUT_SIZE), dtype=jnp.float32)
    out2 = jax.block_until_ready(fwd(x2, packed, n_actions=N_ACTIONS))
    ref2 = _reference(x2, w1, b1, w2, b2)
    assert out2.shape == (B2, N_ACTIONS)
    assert jnp.allclose(out2, ref2, atol=1e-4, rtol=1e-4)

    print("KERNEL_OK")
</pallas_src>

<mosaic_0001>
module attributes {stable_mosaic.version = 11 : i64} {
  func.func @policy_mlp_kernel(%arg0: i32, %arg1: memref<8x4xf32, #tpu.memory_space<vmem>>, %arg2: memref<134x128xf32, #tpu.memory_space<vmem>>, %arg3: memref<8x2xf32, #tpu.memory_space<vmem>>) attributes {dimension_semantics = [#tpu.dimension_semantics<parallel>], iteration_bounds = array<i64: 1>, scalar_prefetch = 0 : i64, scratch_operands = 0 : i64, tpu.core_type = #tpu.core_type<tc>, window_params = [{transform_indices = @transform_0, window_bounds = array<i64: 8, 4>}, {pipeline_mode = #tpu.pipeline_mode<synchronous>, transform_indices = @transform_1, window_bounds = array<i64: 134, 128>}, {transform_indices = @transform_2, window_bounds = array<i64: 8, 2>}]} {
    %c0 = arith.constant 0 : index
    %c0_0 = arith.constant 0 : index
    %0 = vector.load %arg1[%c0, %c0_0] : memref<8x4xf32, #tpu.memory_space<vmem>>, vector<8x4xf32>
    %c0_1 = arith.constant 0 : index
    %c0_2 = arith.constant 0 : index
    %1 = vector.load %arg2[%c0_1, %c0_2] : memref<134x128xf32, #tpu.memory_space<vmem>>, vector<4x128xf32>
    %c4 = arith.constant 4 : index
    %c0_3 = arith.constant 0 : index
    %2 = vector.load %arg2[%c4, %c0_3] : memref<134x128xf32, #tpu.memory_space<vmem>>, vector<1x128xf32>
    %c5 = arith.constant 5 : index
    %c0_4 = arith.constant 0 : index
    %3 = vector.load %arg2[%c5, %c0_4] : memref<134x128xf32, #tpu.memory_space<vmem>>, vector<128x128xf32>
    %c133 = arith.constant 133 : index
    %c0_5 = arith.constant 0 : index
    %4 = vector.load %arg2[%c133, %c0_5] : memref<134x128xf32, #tpu.memory_space<vmem>>, vector<1x128xf32>
    %cst = arith.constant dense<0.000000e+00> : vector<8x128xf32>
    %5 = tpu.matmul %0, %1, %cst {dimension_numbers = #tpu.dot_dimension_numbers<[1], [0], [0], [1], [0, 0, 1, 1], [], []>} : vector<8x4xf32>, vector<4x128xf32>, vector<8x128xf32> -> vector<8x128xf32>
    %6 = vector.broadcast %2 : vector<1x128xf32> to vector<8x128xf32>
    %7 = arith.addf %5, %6 : vector<8x128xf32>
    %cst_6 = arith.constant 0.000000e+00 : f32
    %8 = vector.broadcast %cst_6 : f32 to vector<8x128xf32>
    %9 = arith.maximumf %7, %8 : vector<8x128xf32>
    %cst_7 = arith.constant dense<0.000000e+00> : vector<8x128xf32>
    %10 = tpu.matmul %9, %3, %cst_7 {dimension_numbers = #tpu.dot_dimension_numbers<[1], [0], [0], [1], [0, 0, 1, 1], [], []>} : vector<8x128xf32>, vector<128x128xf32>, vector<8x128xf32> -> vector<8x128xf32>
    %11 = vector.broadcast %4 : vector<1x128xf32> to vector<8x128xf32>
    %12 = arith.addf %10, %11 : vector<8x128xf32>
    %13 = vector.extract_strided_slice %12 {offsets = [0, 0], sizes = [8, 2], strides = [1, 1]} : vector<8x128xf32> to vector<8x2xf32>
    %c0_8 = arith.constant 0 : index
    %c0_9 = arith.constant 0 : index
    %14 = vector.load %arg3[%c0_8, %c0_9] : memref<8x2xf32, #tpu.memory_space<vmem>>, vector<8x2xf32>
    tpu.vector_store %arg3[%c0_8, %c0_9], %13 {strides = array<i32>} : memref<8x2xf32, #tpu.memory_space<vmem>>, vector<8x2xf32>,
    return
  }
  func.func @transform_0(%arg0: i32) -> (i32, i32) {
    %c0_i32 = arith.constant 0 : i32
    %c0_i32_0 = arith.constant 0 : i32
    return %arg0, %c0_i32 : i32, i32
  }
  func.func @transform_1(%arg0: i32) -> (i32, i32) {
    %c0_i32 = arith.constant 0 : i32
    %c0_i32_0 = arith.constant 0 : i32
    %c0_i32_1 = arith.constant 0 : i32
    return %c0_i32, %c0_i32_0 : i32, i32
  }
  func.func @transform_2(%arg0: i32) -> (i32, i32) {
    %c0_i32 = arith.constant 0 : i32
    %c0_i32_0 = arith.constant 0 : i32
    return %arg0, %c0_i32 : i32, i32
  }
}

</mosaic_0001>

<bundles_post_ra>
// kernel: policy_gradient_forward.1
= control target key start
LH: loop header
LB: loop body
LE: loop exit
PB: predicated region body
PF: predicated region fallthrough
CT: control target
= control target key end

     0   :  { %7 = vsyncpa [#allocation3], 0  ;;  %s138_s12 = smov [#allocation2]   ;;  %s139_s14 = smov 128   ;;  %s165_s0 = inlined_call_operand.vmem [shape: f32[8,4], index: 0, kind: input, shape index: {}]   ;;  %s166_s1 = inlined_call_operand.hbm [shape: f32[134,128], index: 1, kind: input, shape index: {}]   ;;  %s167_s2 = inlined_call_operand.vmem [shape: f32[8,2], index: 2, kind: output, shape index: {}]  }
   0x1   :  { %s14_s11 = sshll.u32 %s166_s1, 4  ;;  %s16_s13 = sshll.u32 %s138_s12, 4  ;;  %s15_s11 = int_to_ptr.hbm [resolvable:$true] %s14_s11  ;;  %s17_s13 = int_to_ptr.vmem [resolvable:$true] %s16_s13 }
   0x2   :  { %s140_s15 = smov 8  }
   0x3   :  { %22 = dma.hbm_to_vmem [thread:$0]  %s15_s11, 2176, %s17_s13, [#allocation3], %s139_s14, %s139_s14, %s140_s15  }
   0x4   :  { %136 = dma.done.wait [#allocation3], 2176  }
   0x5   :  { %137 = vsyncadd [#allocation3], 4294965120  ;;  %vm52_vm0 = vcmask 1043456   ;;  %vm48_vm1 = vcmask 31744   ;;  %v28_v0 = vld [vmem:[#allocation2] sm:$0xf] }
   0x6   :  { %v27_v1 = vld [vmem:[%s165_s0] sm:$0xff]  ;;  %105 = vmatpush.msk.msra.mxu0 %vm52_vm0, %v28_v0  ;;  %v44_v3 = vld [vmem:[#allocation2 + $0x75] sm:$0xff]  ;;  %v43_v4 = vld [vmem:[#allocation2 + $0x6d] sm:$0xff]  ;;  %vm98_vm2 = vcmask 15360  }
   0x7   :  { %v45_v2 = vld [vmem:[#allocation2 + $0x7d] sm:$0xff]  ;;  %106 = vmatmul.msk.f32.vlgmr.msra.gmra.mxu0 %vm48_vm1, %v27_v1  ;;  %v42_v5 = vld [vmem:[#allocation2 + $0x65] sm:$0xff]  ;;  %v40_v7 = vld [vmem:[#allocation2 + $0x55] sm:$0xff] }
   0x8   :  { %78 = vmatpush.msra.mxu1 %v45_v2  ;;  %v41_v6 = vld [vmem:[#allocation2 + $0x5d] sm:$0xff]  ;;  %v39_v8 = vld [vmem:[#allocation2 + $0x4d] sm:$0xff]  ;;  %v38_v9 = vld [vmem:[#allocation2 + $0x45] sm:$0xff] }
   0x9   :  { %v37_v10 = vld [vmem:[#allocation2 + $0x3d] sm:$0xff]  ;;  %v36_v11 = vld [vmem:[#allocation2 + $0x35] sm:$0xff]  ;;  %v35_v12 = vld [vmem:[#allocation2 + $0x2d] sm:$0xff] }
   0xa   :  { %79 = vmatpush.msra.mxu1 %v44_v3  ;;  %v34_v13 = vld [vmem:[#allocation2 + $0x25] sm:$0xff]  ;;  %v33_v14 = vld [vmem:[#allocation2 + $0x1d] sm:$0xff]  ;;  %v32_v15 = vld [vmem:[#allocation2 + $0x15] sm:$0xff] }
   0xb   :  { %v31_v16 = vld [vmem:[#allocation2 + $0xd] sm:$0xff]  ;;  %v30_v17 = vld [vmem:[#allocation2 + $0x5] sm:$0xff]  ;;  %v110_v18 = vld [vmem:[#allocation2 + $0x4] ss:$0 sm:$0xff] }
   0xc   :  { %80 = vmatpush.msra.mxu1 %v43_v4  ;;  %v111_v22 = vld [vmem:[#allocation2 + $0x85] ss:$0 sm:$0xff] }
   0xe   :  { %81 = vmatpush.msra.mxu1 %v42_v5 }
  0x10   :  { %82 = vmatpush.msra.mxu1 %v41_v6 }
  0x12   :  { %83 = vmatpush.msra.mxu1 %v40_v7 }
  0x14   :  { %84 = vmatpush.msra.mxu1 %v39_v8 }
  0x16   :  { %85 = vmatpush.msra.mxu1 %v38_v9 }
  0x18   :  { %86 = vmatpush.msra.mxu1 %v37_v10 }
  0x1a   :  { %87 = vmatpush.msra.mxu1 %v36_v11 }
  0x1c   :  { %88 = vmatpush.msra.mxu1 %v35_v12 }
  0x1e   :  { %89 = vmatpush.msra.mxu1 %v34_v13 }
  0x20   :  { %90 = vmatpush.msra.mxu1 %v33_v14 }
  0x22   :  { %91 = vmatpush.msra.mxu1 %v32_v15 }
  0x24   :  { %92 = vmatpush.msra.mxu1 %v31_v16 }
  0x26   :  { %93 = vmatpush.msra.mxu1 %v30_v17 }
  0x84   :  { %v73_v19 = vpop.f32.mrf.mxu0 }
  0x85   :  { %v74_v20 = vadd.f32 %v110_v18, %v73_v19 }
  0x87   :  { %v76_v21 = vmax.f32 %v74_v20, 0.0 }
  0x89   :  { %94 = vmatmul.f32.vlgmr.msra.gmra.mxu1 %v76_v21 }
 0x106   :  { %v95_v23 = vpop.f32.mrf.mxu1 }
 0x107   :  { %v96_v24 = vadd.f32 %v111_v22, %v95_v23 }
 0x109   :  { %99 = vst.msk [vmem:[%s167_s2] sm:$0xff] %vm98_vm2, %v96_v24 }
 0x10a   :  { %104 = vsyncpa [#allocation3], 1 }

</bundles_post_ra>
